<compile_context>
chip_gen: v7x
topology: tpu7x:2x2x1
jax: 0.10.0
libtpu: 0.0.40
codegen_flags: <defaults>
</compile_context>

<pallas_src>
import functools

import jax
import jax.numpy as jnp
from jax.experimental import pallas as pl
from jax.experimental.pallas import tpu as pltpu

# ----------------------------- config ---------------------------------------
N = 2          # batch
C_IN = 4       # n_inputs
C_OUT = 8      # n_outputs
L = 16         # sequence length
K = 3          # kernel_size
STRIDE = 1
DILATION = 2
PADDING = (K - 1) * DILATION   # = 4, the usual causal TCN padding
EPS = 1e-5


def _round_up8(n):
  return -(-n // 8) * 8


# ----------------------------- Pallas kernel --------------------------------
def _im2col(x_flat, c, nb, l, k, dil, pad, extra_rows):
  """Build im2col columns from a (c, nb*l) value.

  Returns (k*c + extra_rows, nb*l).  The trailing `extra_rows` rows are all
  ones: the first carries the folded conv bias (via the weight matrix) and the
  rest hit zero weight columns — they only round the MXU contraction up to a
  multiple of 8 sublanes.  Everything here is value-level (vreg) work: no
  scratch stores, no reloads.
  """
  dt = x_flat.dtype
  zeros_pad = jnp.zeros((c, pad), dt)
  per_batch = []
  for b in range(nb):
    xb = x_flat[:, b * l:(b + 1) * l]                          # (c, l)
    xpad = jnp.concatenate([zeros_pad, xb], axis=1)            # (c, l+pad)
    taps = [xpad[:, t * dil: t * dil + l] for t in range(k)]   # k x (c, l)
    per_batch.append(jnp.concatenate(taps, axis=0))            # (k*c, l)
  cols = jnp.concatenate(per_batch, axis=1)                    # (k*c, nb*l)
  ones = jnp.ones((extra_rows, nb * l), dt)
  return jnp.concatenate([cols, ones], axis=0)


def _temporal_block_kernel(
    x_ref,      # (C_in, N*L)          input, time*batch on lanes
    w1d_ref,    # (2*C_out, R1P)       conv1 taps + folded downsample + biases
    w2_ref,     # (C_out, R2P)         conv2 taps + folded bias
    p_ref,      # (C_out, 4)           packed [g1, be1, g2, be2]
    out_ref,    # (C_out, N*L)
    *, nb, c_in, c_out, l, k, dil, pad, eps,
):
  f32 = jnp.float32
  inv_cnt = 1.0 / float(nb * l)

  # Per-channel BN params: channel on sublanes -> (C_out, 1) broadcasts over
  # the fused (N*L) lane axis.
  p = p_ref[...].astype(f32)
  g1, be1, g2, be2 = p[:, 0:1], p[:, 1:2], p[:, 2:3], p[:, 3:4]

  x = x_ref[...].astype(f32)           # (C_in, N*L)
  w1d = w1d_ref[...].astype(f32)       # (2*C_out, R1P)
  w2 = w2_ref[...].astype(f32)         # (C_out, R2P)
  r1p = w1d.shape[1]
  r2p = w2.shape[1]

  # ---- conv1 (+ folded 1x1 residual, folded biases): ONE matmul -------------
  cols1 = _im2col(x, c_in, nb, l, k, dil, pad, r1p - k * c_in)
  y = jnp.dot(w1d, cols1, preferred_element_type=f32)    # (2*C_out, N*L)
  h1 = jnp.maximum(y[:c_out, :], 0.0)                    # relu(conv1 + b1)
  res = y[c_out:, :]                                     # downsample(x) + bd

  # ---- BN1: training-mode batch stats over (N, L), two-pass variance --------
  m1 = jnp.sum(h1, axis=1, keepdims=True) * inv_cnt
  d1 = h1 - m1
  v1 = jnp.sum(d1 * d1, axis=1, keepdims=True) * inv_cnt
  h1 = d1 * jax.lax.rsqrt(v1 + eps) * g1 + be1
  # dropout: identity (see TODO at top)

  # ---- conv2 (folded bias): ONE matmul ---------------------------------------
  cols2 = _im2col(h1, c_out, nb, l, k, dil, pad, r2p - k * c_out)
  y2 = jnp.dot(w2, cols2, preferred_element_type=f32)    # (C_out, N*L)
  h2 = jnp.maximum(y2, 0.0)                              # relu(conv2 + b2)

  # ---- BN2 + residual add + final relu; single store of out_ref -------------
  m2 = jnp.sum(h2, axis=1, keepdims=True) * inv_cnt
  d2 = h2 - m2
  v2 = jnp.sum(d2 * d2, axis=1, keepdims=True) * inv_cnt
  h2 = d2 * jax.lax.rsqrt(v2 + eps) * g2 + be2
  out_ref[...] = jnp.maximum(h2 + res, 0.0).astype(out_ref.dtype)


# ----------------------------- wrapper ---------------------------------------
def pack_params(params):
  """One-time parameter preprocessing into kernel-friendly fused layouts."""
  k, c_in, c_out = params["w1"].shape
  r1p = _round_up8(k * c_in + 1)    # taps + bias row, padded to 8-sublane mult
  r2p = _round_up8(k * c_out + 1)

  # Conv weights with out-channel leading and (tap, in-channel) flattened.
  w1k = jnp.transpose(params["w1"], (2, 0, 1)).reshape(c_out, k * c_in)
  w2k = jnp.transpose(params["w2"], (2, 0, 1)).reshape(c_out, k * c_out)

  # conv1 fused weight: rows [0:C_out] conv1, rows [C_out:2*C_out] the folded
  # 1x1 downsample (its input equals the t = K-1 tap slice since
  # pad == (K-1)*dilation).  Column k*c_in is the folded bias (the im2col
  # appends a constant-1 row there); remaining padding columns are zero.
  w1d = jnp.zeros((2 * c_out, r1p), jnp.float32)
  w1d = w1d.at[:c_out, :k * c_in].set(w1k)
  w1d = w1d.at[:c_out, k * c_in].set(params["b1"][0])
  w1d = w1d.at[c_out:, (k - 1) * c_in:k * c_in].set(params["wd"].T)
  w1d = w1d.at[c_out:, k * c_in].set(params["bd"][0])

  w2f = jnp.zeros((c_out, r2p), jnp.float32)
  w2f = w2f.at[:, :k * c_out].set(w2k)
  w2f = w2f.at[:, k * c_out].set(params["b2"][0])

  # Pack the 4 per-channel BN vectors into a single (C_out, 4) array.
  pp = jnp.stack([params["g1"][0], params["be1"][0],
                  params["g2"][0], params["be2"][0]], axis=1)
  return dict(w1d=w1d, w2=w2f, pp=pp)


def temporal_block_pallas(x_ncl, packed):
  """x_ncl: (N, C_in, L) — PyTorch NCL layout. Returns (N, C_out, L)."""
  n, c_in, l = x_ncl.shape
  c_out = packed["w2"].shape[0]

  # Wrapper-side layout plumbing only: lane-major (C_in, N*L), no padding.
  x2 = jnp.transpose(x_ncl, (1, 0, 2)).reshape(c_in, n * l)

  kern = functools.partial(
      _temporal_block_kernel,
      nb=n, c_in=c_in, c_out=c_out, l=l, k=K, dil=DILATION, pad=PADDING,
      eps=EPS)

  r1p = packed["w1d"].shape[1]
  r2p = packed["w2"].shape[1]
  flops = 2 * n * l * (2 * c_out * r1p + c_out * r2p)
  bytes_accessed = 4 * (x2.size + packed["w1d"].size + packed["w2"].size
                        + packed["pp"].size + c_out * n * l)

  vmem = pl.BlockSpec(memory_space=pltpu.MemorySpace.VMEM)
  out2 = pl.pallas_call(
      kern,
      out_shape=jax.ShapeDtypeStruct((c_out, n * l), jnp.float32),
      in_specs=[vmem] * 4,
      out_specs=vmem,
      cost_estimate=pl.CostEstimate(
          flops=flops, transcendentals=2 * c_out,
          bytes_accessed=bytes_accessed),
  )(x2, packed["w1d"], packed["w2"], packed["pp"])

  # Back to PyTorch NCL layout (wrapper-side plumbing).
  return jnp.transpose(out2.reshape(c_out, n, l), (1, 0, 2))


# ----------------------------- pure-JAX reference ----------------------------
def _conv1d_torch_like(x, w_oik, b, dilation, padding):
  # x: (N, C_in, L); w_oik: (C_out, C_in, K); matches nn.Conv1d semantics.
  y = jax.lax.conv_general_dilated(
      x, w_oik, window_strides=(1,), padding=[(padding, padding)],
      rhs_dilation=(dilation,), dimension_numbers=("NCH", "OIH", "NCH"))
  return y + b[None, :, None]


def temporal_block_reference(x_ncl, params):
  w1_oik = jnp.transpose(params["w1"], (2, 1, 0))   # (C_out, C_in, K)
  w2_oik = jnp.transpose(params["w2"], (2, 1, 0))
  wd_oik = jnp.transpose(params["wd"], (1, 0))[:, :, None]

  def bn_relu(h, gamma, beta):
    h = jnp.maximum(h, 0.0)
    mean = jnp.mean(h, axis=(0, 2), keepdims=True)
    var = jnp.mean((h - mean) ** 2, axis=(0, 2), keepdims=True)
    h = (h - mean) * jax.lax.rsqrt(var + EPS)
    return h * gamma[0][None, :, None] + beta[0][None, :, None]

  res = _conv1d_torch_like(x_ncl, wd_oik, params["bd"][0], 1, 0)
  h = _conv1d_torch_like(x_ncl, w1_oik, params["b1"][0], DILATION, PADDING)
  h = h[:, :, :-PADDING]
  h = bn_relu(h, params["g1"], params["be1"])        # dropout = identity
  h2 = _conv1d_torch_like(h, w2_oik, params["b2"][0], DILATION, PADDING)
  h2 = h2[:, :, :-PADDING]
  h2 = bn_relu(h2, params["g2"], params["be2"])      # dropout = identity
  return jnp.maximum(h2 + res, 0.0)


# ----------------------------- params ----------------------------------------
def init_params(key):
  ks = jax.random.split(key, 6)
  # weight_norm(conv): W = g * V / ||V||, g initialized to ||V|| -> W == V.
  # init_weights() then draws the weights from N(0, 0.01).
  w1 = 0.01 * jax.random.normal(ks[0], (K, C_IN, C_OUT), jnp.float32)
  w2 = 0.01 * jax.random.normal(ks[1], (K, C_OUT, C_OUT), jnp.float32)
  wd = 0.01 * jax.random.normal(ks[2], (C_IN, C_OUT), jnp.float32)
  # Conv1d biases (deterministic small values for the synthetic module).
  b1 = 0.05 * jax.random.normal(ks[3], (1, C_OUT), jnp.float32)
  b2 = 0.05 * jax.random.normal(ks[4], (1, C_OUT), jnp.float32)
  bd = 0.05 * jax.random.normal(ks[5], (1, C_OUT), jnp.float32)
  # BatchNorm1d defaults: gamma = 1, beta = 0.
  g1 = jnp.ones((1, C_OUT), jnp.float32)
  be1 = jnp.zeros((1, C_OUT), jnp.float32)
  g2 = jnp.ones((1, C_OUT), jnp.float32)
  be2 = jnp.zeros((1, C_OUT), jnp.float32)
  return dict(w1=w1, b1=b1, w2=w2, b2=b2, wd=wd, bd=bd,
              g1=g1, be1=be1, g2=g2, be2=be2)


# ----------------------------- main ------------------------------------------
if __name__ == "__main__":
  key = jax.random.PRNGKey(0)
  k_x, k_p = jax.random.split(key)
  x = jax.random.normal(k_x, (N, C_IN, L), jnp.float32)   # PyTorch NCL input
  params = init_params(k_p)
  packed = pack_params(params)                             # one-time prep

  out = temporal_block_pallas(x, packed)
  out = jax.block_until_ready(out)

  ref = temporal_block_reference(x, params)
  assert out.shape == (N, C_OUT, L), out.shape
  max_err = float(jnp.max(jnp.abs(out - ref)))
  assert jnp.allclose(out, ref, atol=1e-4, rtol=1e-4), max_err

  print("KERNEL_OK")
</pallas_src>

<mosaic_0001>
module attributes {stable_mosaic.version = 11 : i64} {
  func.func @_temporal_block_kernel(%arg0: memref<4x32xf32, #tpu.memory_space<vmem>>, %arg1: memref<16x16xf32, #tpu.memory_space<vmem>>, %arg2: memref<8x32xf32, #tpu.memory_space<vmem>>, %arg3: memref<8x4xf32, #tpu.memory_space<vmem>>, %arg4: memref<8x32xf32, #tpu.memory_space<vmem>>) attributes {dimension_semantics = [], scalar_prefetch = 0 : i64, scratch_operands = 0 : i64, tpu.core_type = #tpu.core_type<tc>} {
    %c0 = arith.constant 0 : index
    %c0_0 = arith.constant 0 : index
    %0 = vector.load %arg3[%c0, %c0_0] : memref<8x4xf32, #tpu.memory_space<vmem>>, vector<8x4xf32>
    %1 = vector.extract_strided_slice %0 {offsets = [0, 0], sizes = [8, 1], strides = [1, 1]} : vector<8x4xf32> to vector<8x1xf32>
    %2 = vector.extract_strided_slice %0 {offsets = [0, 1], sizes = [8, 1], strides = [1, 1]} : vector<8x4xf32> to vector<8x1xf32>
    %3 = vector.extract_strided_slice %0 {offsets = [0, 2], sizes = [8, 1], strides = [1, 1]} : vector<8x4xf32> to vector<8x1xf32>
    %4 = vector.extract_strided_slice %0 {offsets = [0, 3], sizes = [8, 1], strides = [1, 1]} : vector<8x4xf32> to vector<8x1xf32>
    %c0_1 = arith.constant 0 : index
    %c0_2 = arith.constant 0 : index
    %5 = vector.load %arg0[%c0_1, %c0_2] : memref<4x32xf32, #tpu.memory_space<vmem>>, vector<4x32xf32>
    %c0_3 = arith.constant 0 : index
    %c0_4 = arith.constant 0 : index
    %6 = vector.load %arg1[%c0_3, %c0_4] : memref<16x16xf32, #tpu.memory_space<vmem>>, vector<16x16xf32>
    %c0_5 = arith.constant 0 : index
    %c0_6 = arith.constant 0 : index
    %7 = vector.load %arg2[%c0_5, %c0_6] : memref<8x32xf32, #tpu.memory_space<vmem>>, vector<8x32xf32>
    %cst = arith.constant 0.000000e+00 : f32
    %8 = vector.broadcast %cst : f32 to vector<4x4xf32>
    %9 = vector.extract_strided_slice %5 {offsets = [0, 0], sizes = [4, 16], strides = [1, 1]} : vector<4x32xf32> to vector<4x16xf32>
    %10 = tpu.concatenate %8, %9 in 1 : vector<4x4xf32>, vector<4x16xf32> -> vector<4x20xf32>
    %11 = vector.extract_strided_slice %10 {offsets = [0, 0], sizes = [4, 16], strides = [1, 1]} : vector<4x20xf32> to vector<4x16xf32>
    %12 = vector.extract_strided_slice %10 {offsets = [0, 2], sizes = [4, 16], strides = [1, 1]} : vector<4x20xf32> to vector<4x16xf32>
    %13 = vector.extract_strided_slice %10 {offsets = [0, 4], sizes = [4, 16], strides = [1, 1]} : vector<4x20xf32> to vector<4x16xf32>
    %14 = tpu.concatenate %11, %12, %13 in 0 : vector<4x16xf32>, vector<4x16xf32>, vector<4x16xf32> -> vector<12x16xf32>
    %15 = vector.extract_strided_slice %5 {offsets = [0, 16], sizes = [4, 16], strides = [1, 1]} : vector<4x32xf32> to vector<4x16xf32>
    %16 = tpu.concatenate %8, %15 in 1 : vector<4x4xf32>, vector<4x16xf32> -> vector<4x20xf32>
    %17 = vector.extract_strided_slice %16 {offsets = [0, 0], sizes = [4, 16], strides = [1, 1]} : vector<4x20xf32> to vector<4x16xf32>
    %18 = vector.extract_strided_slice %16 {offsets = [0, 2], sizes = [4, 16], strides = [1, 1]} : vector<4x20xf32> to vector<4x16xf32>
    %19 = vector.extract_strided_slice %16 {offsets = [0, 4], sizes = [4, 16], strides = [1, 1]} : vector<4x20xf32> to vector<4x16xf32>
    %20 = tpu.concatenate %17, %18, %19 in 0 : vector<4x16xf32>, vector<4x16xf32>, vector<4x16xf32> -> vector<12x16xf32>
    %21 = tpu.concatenate %14, %20 in 1 : vector<12x16xf32>, vector<12x16xf32> -> vector<12x32xf32>
    %cst_7 = arith.constant 1.000000e+00 : f32
    %22 = vector.broadcast %cst_7 : f32 to vector<4x32xf32>
    %23 = tpu.concatenate %21, %22 in 0 : vector<12x32xf32>, vector<4x32xf32> -> vector<16x32xf32>
    %cst_8 = arith.constant dense<0.000000e+00> : vector<16x32xf32>
    %24 = tpu.matmul %6, %23, %cst_8 {dimension_numbers = #tpu.dot_dimension_numbers<[1], [0], [0], [1], [0, 0, 1, 1], [], []>} : vector<16x16xf32>, vector<16x32xf32>, vector<16x32xf32> -> vector<16x32xf32>
    %25 = vector.extract_strided_slice %24 {offsets = [0, 0], sizes = [8, 32], strides = [1, 1]} : vector<16x32xf32> to vector<8x32xf32>
    %cst_9 = arith.constant 0.000000e+00 : f32
    %26 = vector.broadcast %cst_9 : f32 to vector<8x32xf32>
    %27 = arith.maximumf %25, %26 : vector<8x32xf32>
    %28 = vector.extract_strided_slice %24 {offsets = [8, 0], sizes = [8, 32], strides = [1, 1]} : vector<16x32xf32> to vector<8x32xf32>
    %cst_10 = arith.constant dense<0.000000e+00> : vector<8xf32>
    %29 = vector.multi_reduction <add>, %27, %cst_10 [1] : vector<8x32xf32> to vector<8xf32>
    %30 = vector.shape_cast %29 : vector<8xf32> to vector<8x1xf32>
    %cst_11 = arith.constant 3.125000e-02 : f32
    %31 = vector.broadcast %cst_11 : f32 to vector<8x1xf32>
    %32 = arith.mulf %30, %31 : vector<8x1xf32>
    %33 = vector.broadcast %32 : vector<8x1xf32> to vector<8x32xf32>
    %34 = arith.subf %27, %33 : vector<8x32xf32>
    %35 = arith.mulf %34, %34 : vector<8x32xf32>
    %cst_12 = arith.constant dense<0.000000e+00> : vector<8xf32>
    %36 = vector.multi_reduction <add>, %35, %cst_12 [1] : vector<8x32xf32> to vector<8xf32>
    %37 = vector.shape_cast %36 : vector<8xf32> to vector<8x1xf32>
    %cst_13 = arith.constant 3.125000e-02 : f32
    %38 = vector.broadcast %cst_13 : f32 to vector<8x1xf32>
    %39 = arith.mulf %37, %38 : vector<8x1xf32>
    %cst_14 = arith.constant 9.99999974E-6 : f32
    %40 = vector.broadcast %cst_14 : f32 to vector<8x1xf32>
    %41 = arith.addf %39, %40 : vector<8x1xf32>
    %42 = math.rsqrt %41 : vector<8x1xf32>
    %43 = vector.broadcast %42 : vector<8x1xf32> to vector<8x32xf32>
    %44 = arith.mulf %34, %43 : vector<8x32xf32>
    %45 = vector.broadcast %1 : vector<8x1xf32> to vector<8x32xf32>
    %46 = arith.mulf %44, %45 : vector<8x32xf32>
    %47 = vector.broadcast %2 : vector<8x1xf32> to vector<8x32xf32>
    %48 = arith.addf %46, %47 : vector<8x32xf32>
    %cst_15 = arith.constant 0.000000e+00 : f32
    %49 = vector.broadcast %cst_15 : f32 to vector<8x4xf32>
    %50 = vector.extract_strided_slice %48 {offsets = [0, 0], sizes = [8, 16], strides = [1, 1]} : vector<8x32xf32> to vector<8x16xf32>
    %51 = tpu.concatenate %49, %50 in 1 : vector<8x4xf32>, vector<8x16xf32> -> vector<8x20xf32>
    %52 = vector.extract_strided_slice %51 {offsets = [0, 0], sizes = [8, 16], strides = [1, 1]} : vector<8x20xf32> to vector<8x16xf32>
    %53 = vector.extract_strided_slice %51 {offsets = [0, 2], sizes = [8, 16], strides = [1, 1]} : vector<8x20xf32> to vector<8x16xf32>
    %54 = vector.extract_strided_slice %51 {offsets = [0, 4], sizes = [8, 16], strides = [1, 1]} : vector<8x20xf32> to vector<8x16xf32>
    %55 = tpu.concatenate %52, %53, %54 in 0 : vector<8x16xf32>, vector<8x16xf32>, vector<8x16xf32> -> vector<24x16xf32>
    %56 = vector.extract_strided_slice %48 {offsets = [0, 16], sizes = [8, 16], strides = [1, 1]} : vector<8x32xf32> to vector<8x16xf32>
    %57 = tpu.concatenate %49, %56 in 1 : vector<8x4xf32>, vector<8x16xf32> -> vector<8x20xf32>
    %58 = vector.extract_strided_slice %57 {offsets = [0, 0], sizes = [8, 16], strides = [1, 1]} : vector<8x20xf32> to vector<8x16xf32>
    %59 = vector.extract_strided_slice %57 {offsets = [0, 2], sizes = [8, 16], strides = [1, 1]} : vector<8x20xf32> to vector<8x16xf32>
    %60 = vector.extract_strided_slice %57 {offsets = [0, 4], sizes = [8, 16], strides = [1, 1]} : vector<8x20xf32> to vector<8x16xf32>
    %61 = tpu.concatenate %58, %59, %60 in 0 : vector<8x16xf32>, vector<8x16xf32>, vector<8x16xf32> -> vector<24x16xf32>
    %62 = tpu.concatenate %55, %61 in 1 : vector<24x16xf32>, vector<24x16xf32> -> vector<24x32xf32>
    %cst_16 = arith.constant 1.000000e+00 : f32
    %63 = vector.broadcast %cst_16 : f32 to vector<8x32xf32>
    %64 = tpu.concatenate %62, %63 in 0 : vector<24x32xf32>, vector<8x32xf32> -> vector<32x32xf32>
    %cst_17 = arith.constant dense<0.000000e+00> : vector<8x32xf32>
    %65 = tpu.matmul %7, %64, %cst_17 {dimension_numbers = #tpu.dot_dimension_numbers<[1], [0], [0], [1], [0, 0, 1, 1], [], []>} : vector<8x32xf32>, vector<32x32xf32>, vector<8x32xf32> -> vector<8x32xf32>
    %cst_18 = arith.constant 0.000000e+00 : f32
    %66 = vector.broadcast %cst_18 : f32 to vector<8x32xf32>
    %67 = arith.maximumf %65, %66 : vector<8x32xf32>
    %cst_19 = arith.constant dense<0.000000e+00> : vector<8xf32>
    %68 = vector.multi_reduction <add>, %67, %cst_19 [1] : vector<8x32xf32> to vector<8xf32>
    %69 = vector.shape_cast %68 : vector<8xf32> to vector<8x1xf32>
    %cst_20 = arith.constant 3.125000e-02 : f32
    %70 = vector.broadcast %cst_20 : f32 to vector<8x1xf32>
    %71 = arith.mulf %69, %70 : vector<8x1xf32>
    %72 = vector.broadcast %71 : vector<8x1xf32> to vector<8x32xf32>
    %73 = arith.subf %67, %72 : vector<8x32xf32>
    %74 = arith.mulf %73, %73 : vector<8x32xf32>
    %cst_21 = arith.constant dense<0.000000e+00> : vector<8xf32>
    %75 = vector.multi_reduction <add>, %74, %cst_21 [1] : vector<8x32xf32> to vector<8xf32>
    %76 = vector.shape_cast %75 : vector<8xf32> to vector<8x1xf32>
    %cst_22 = arith.constant 3.125000e-02 : f32
    %77 = vector.broadcast %cst_22 : f32 to vector<8x1xf32>
    %78 = arith.mulf %76, %77 : vector<8x1xf32>
    %cst_23 = arith.constant 9.99999974E-6 : f32
    %79 = vector.broadcast %cst_23 : f32 to vector<8x1xf32>
    %80 = arith.addf %78, %79 : vector<8x1xf32>
    %81 = math.rsqrt %80 : vector<8x1xf32>
    %82 = vector.broadcast %81 : vector<8x1xf32> to vector<8x32xf32>
    %83 = arith.mulf %73, %82 : vector<8x32xf32>
    %84 = vector.broadcast %3 : vector<8x1xf32> to vector<8x32xf32>
    %85 = arith.mulf %83, %84 : vector<8x32xf32>
    %86 = vector.broadcast %4 : vector<8x1xf32> to vector<8x32xf32>
    %87 = arith.addf %85, %86 : vector<8x32xf32>
    %88 = arith.addf %87, %28 : vector<8x32xf32>
    %cst_24 = arith.constant 0.000000e+00 : f32
    %89 = vector.broadcast %cst_24 : f32 to vector<8x32xf32>
    %90 = arith.maximumf %88, %89 : vector<8x32xf32>
    %c0_25 = arith.constant 0 : index
    %c0_26 = arith.constant 0 : index
    %91 = vector.load %arg4[%c0_25, %c0_26] : memref<8x32xf32, #tpu.memory_space<vmem>>, vector<8x32xf32>
    tpu.vector_store %arg4[%c0_25, %c0_26], %90 {strides = array<i32>} : memref<8x32xf32, #tpu.memory_space<vmem>>, vector<8x32xf32>,
    return
  }
}

</mosaic_0001>

<bundles_post_ra>
// kernel: tpu_custom_call.1
= control target key start
LH: loop header
LB: loop body
LE: loop exit
PB: predicated region body
PF: predicated region fallthrough
CT: control target
= control target key end

     0   :  { %9 = vsyncpa [#allocation3], 0  ;;  %s574_s0 = inlined_call_operand.vmem [shape: f32[4,32], index: 0, kind: input, shape index: {}]   ;;  %s575_s1 = inlined_call_operand.hbm [shape: f32[16,16], index: 1, kind: input, shape index: {}]   ;;  %s576_s2 = inlined_call_operand.vmem [shape: f32[8,32], index: 2, kind: input, shape index: {}]   ;;  %s577_s3 = inlined_call_operand.vmem [shape: f32[8,4], index: 3, kind: input, shape index: {}]   ;;  %s578_s4 = inlined_call_operand.hbm [shape: f32[8,32], index: 4, kind: output, shape index: {}]  }
   0x1   :  { %10 = vsyncpa [#allocation4], 0  ;;  %s455_s15 = smov [#allocation2]   ;;  %s407_s19 = scalar_lea.hbm %s575_s1, 256 }
   0x2   :  { %s18_s16 = sshll.u32 %s455_s15, 4  ;;  %p408_p0 = scmp.ne.s32.totalorder %s575_s1, %s407_s19  ;;  %s19_s16 = int_to_ptr.vmem [resolvable:$true] %s18_s16 }
   0x3   :  { %p411_p1 = scmp.lt.u32.totalorder %s407_s19, %s575_s1 }
   0x5   :  { %p413_p2 = pnand %p411_p1, %p408_p0 }
   0x7   :  { %416 = shalt.err (!%p413_p2)
}
   0x8   :  { %s417_s24 = scalar_lea.vmem %s19_s16, 256  ;;  %p422_p4 = scmp.lt.s32.totalorder %s19_s16, %s19_s16 }
   0x9   :  { %p418_p3 = scmp.ne.s32.totalorder %s19_s16, %s417_s24  ;;  %p423_p5 = scmp.lt.s32.totalorder %s417_s24, %s417_s24 }
   0xb   :  { %p424_p6 = por %p423_p5, %p422_p4 }
   0xd   :  { %p425_p7 = pnand %p424_p6, %p418_p3 }
   0xf   :  { %428 = shalt.err (!%p425_p7)
}
  0x10   :  { %s456_s25 = smov 128   ;;  %s457_s26 = smov 8  }
  0x11   :  { %24 = dma.hbm_to_vmem [thread:$0]  %s575_s1, 256, %s19_s16, [#allocation3], %s456_s25, %s456_s25, %s457_s26  }
  0x12   :  { %451 = dma.done.wait [#allocation3], 256  }
  0x13   :  { %452 = vsyncadd [#allocation3], 4294967040  ;;  %v33_v0 = vld [vmem:[%s574_s0] sm:$0xf]  ;;  %s458_s5 = smov 116   ;;  %s459_s6 = smov 4  }
  0x14   :  { %53 = vrot.lane.b32.xlu0 %v33_v0, %s458_s5  ;;  %vm41_vm0 = vcmask 31744   ;;  %s460_s7 = smov 126   ;;  %s461_s1 = smov 124   ;;  %vm51_vm1 = vcmask 1043456   ;;  %vm72_vm2 = vcmask 130048   ;;  %v34_v8 = vld [vmem:[#allocation2] sm:$0xff] }
  0x15   :  { %347 = vmatprep.mubr.msk.f32.mxu0 %vm72_vm2, %v34_v8  ;;  %s462_s0 = smov 16   ;;  %v35_v22 = vld [vmem:[#allocation2 + $0x8] sm:$0xff]  ;;  %vm158_vm3 = vcmask 261120   ;;  %v463_v27 = vmov 0   ;;  %v534_v28 = vld [vmem:[%s577_s3] sm:$0xff]  ;;  %v464_v29 = vmov 1  }
  0x16   :  { %393 = vset.pattern.permute.xlu0 %v463_v27  ;;  %394 = vset.pattern.permute.xlu1 %v464_v29  ;;  %v465_v48 = vmov 0.0|0.0   ;;  %vm466_vm4 = vmmov 0   ;;  %v467_v50 = vmov 0.0   ;;  %v468_v63 = vmov 1.0  }
  0x17   :  { %365 = vmatprep.subr.bf16.mxu1 %v465_v48  ;;  %358 = vmatprep.mubr.msk.f32.mxu1 %vm466_vm4, %v467_v50 }
  0x18   :  { %38 = vrot.lane.b32.xlu0 %v33_v0, %s459_s6 }
  0x86   :  { %v54_v1 = vpop.permute.xlu0 %53 }
  0x87   :  { %v56_v2 = vsel %vm41_vm0, 0.0, %v54_v1  ;;  %v36_v1 = vld [vmem:[%s576_s2] sm:$0xff]  ;;  %s471_s2 = smov [#allocation5]  }
  0x88   :  { %v58_v3 = vrot.slane %v56_v2, 4  ;;  %s322_s11 = sshll.u32 %s471_s2, 4  ;;  %s323_s11 = int_to_ptr.vmem [resolvable:$true] %s322_s11 }
  0x89   :  { %s429_s12 = scalar_lea.vmem %s323_s11, 128  ;;  %p434_p9 = scmp.lt.s32.totalorder %s323_s11, %s323_s11 }
  0x8a   :  { %59 = vrot.lane.b32.xlu1 %v58_v3, %s460_s7  ;;  %v39_v4 = vpop.permute.xlu0 %38  ;;  %p430_p8 = scmp.ne.s32.totalorder %s323_s11, %s429_s12  ;;  %p435_p10 = scmp.lt.s32.totalorder %s429_s12, %s429_s12 }
  0x8b   :  { %v42_v5 = vsel %vm41_vm0, 0.0, %v39_v4 }
  0x8c   :  { %v44_v6 = vrot.slane %v42_v5, 4  ;;  %p436_p11 = por %p435_p10, %p434_p9 }
  0x8e   :  { %62 = vrot.lane.b32.xlu1 %v56_v2, %s461_s1  ;;  %45 = vrot.lane.b32.xlu0 %v44_v6, %s460_s7  ;;  %v469_v6 = vmov 2   ;;  %p437_p12 = pnand %p436_p11, %p430_p8 }
  0x92   :  { %48 = vrot.lane.b32.xlu1 %v42_v5, %s461_s1 }
  0xfc   :  { %v60_v7 = vpop.permute.xlu1 %59 }
  0xfd   :  { %v64_v9 = vsel %vm51_vm1, %v56_v2, %v60_v7  ;;  %v470_v7 = vmov 3  }
 0x100   :  { %v63_v10 = vpop.permute.xlu1 %62  ;;  %v46_v12 = vpop.permute.xlu0 %45 }
 0x101   :  { %v388_v11 = vpack.i.bf16 %v64_v9, %v63_v10  ;;  %v52_v16 = vsel %vm51_vm1, %v42_v5, %v46_v12 }
 0x103   :  { %389 = vrot.lane.b32.xlu0 %v388_v11, %s462_s0 }
 0x104   :  { %v49_v17 = vpop.permute.xlu1 %48 }
 0x175   :  { %v390_v13 = vpop.permute.xlu0 %389 }
 0x176   :  { %v392_v14 = vunpack.i.h.bf16 %v390_v13  ;;  %v391_v15 = vunpack.i.l.bf16 %v390_v13 }
 0x178   :  { %v73_v18 = vsel %vm72_vm2, %v52_v16, %v392_v14  ;;  %v74_v19 = vsel %vm72_vm2, %v49_v17, %v391_v15 }
 0x179   :  { %v75_v20 = vsel %vm51_vm1, %v74_v19, 1.0 }
 0x17a   :  { %v361_v21 = vpack.c.bf16 %v75_v20, %v73_v18 }
 0x17c   :  { %362 = vmatprep.subr.bf16.mxu0 %v361_v21 }
 0x17d   :  { %364 = vmatpush3.bf16.msra.mxu0 %v361_v21 }
 0x180   :  { %348 = vmatmul.mubr.msk.f32.vlgmr.msra.gmra.mrb[0].mxu0 %vm72_vm2, %v35_v22 }
 0x253   :  { %v528_v23 = vpop.f32.mrb[0].mxu0 }
 0x254   :  { %v148_v24 = vpop.f32.mrb[1].mxu0 }
 0x255   :  { %v157_v25 = vmax.f32 %v148_v24, 0.0 }
 0x257   :  { %v159_v26 = vsel %vm158_vm3, %v157_v25, 0.0 }
 0x258   :  { %160 = vadd.xlane.f32.xlu1 %v159_v26 }
 0x269   :  { %179 = vperm.xlu1 %394, %v534_v28  }
 0x26d   :  { %401 = vset.pattern.permute.xlu1 %v470_v7 }
 0x2e5   :  { %v161_v30 = vpop.xlane.xlu1 %160 }
 0x2e6   :  { %v162_v31 = vmul.f32 0.03125, %v161_v30 }
 0x2e8   :  { %v163_v32 = vsub.f32 %v157_v25, %v162_v31 }
 0x2e9   :  { %v180_v41 = vpop.permute.xlu1 %179 }
 0x2ea   :  { %v164_v33 = vmul.f32 %v163_v32, %v163_v32 }
 0x2ec   :  { %v165_v34 = vsel %vm158_vm3, %v164_v33, 0.0 }
 0x2ed   :  { %166 = vadd.xlane.f32.xlu0 %v165_v34 }
 0x303   :  { %174 = vperm.xlu0 %393, %v534_v28  }
 0x307   :  { %400 = vset.pattern.permute.xlu0 %v469_v6 }
 0x37a   :  { %v167_v35 = vpop.xlane.xlu0 %166 }
 0x37b   :  { %v168_v36 = vmul.f32 0.03125, %v167_v35 }
 0x37d   :  { %v169_v37 = vadd.f32 1e-05, %v168_v36 }
 0x37f   :  { %403 = vrsqrt.f32 %v169_v37 }
 0x382   :  { %v175_v39 = vpop.permute.xlu0 %174 }
 0x389   :  { %v404_v38 = vpop.eup %403 }
 0x38a   :  { %v171_v40 = vmul.f32 %v404_v38, %v163_v32 }
 0x38c   :  { %v177_v42 = vmul.f32 %v175_v39, %v171_v40 }
 0x38e   :  { %v182_v43 = vadd.f32 %v180_v41, %v177_v42 }
 0x390   :  { %195 = vrot.lane.b32.xlu1 %v182_v43, %s458_s5 }
 0x394   :  { %184 = vrot.lane.b32.xlu1 %v182_v43, %s459_s6 }
 0x402   :  { %v196_v44 = vpop.permute.xlu1 %195 }
 0x403   :  { %v198_v45 = vsel %vm41_vm0, 0.0, %v196_v44 }
 0x404   :  { %200 = vrot.lane.b32.xlu1 %v198_v45, %s460_s7 }
 0x406   :  { %v185_v46 = vpop.permute.xlu1 %184 }
 0x407   :  { %v187_v47 = vsel %vm41_vm0, 0.0, %v185_v46 }
 0x408   :  { %202 = vrot.lane.b32.xlu1 %v198_v45, %s461_s1 }
 0x40c   :  { %189 = vrot.lane.b32.xlu1 %v187_v47, %s460_s7 }
 0x476   :  { %v201_v49 = vpop.permute.xlu1 %200 }
 0x477   :  { %v395_v51 = vpack.i.bf16 %v201_v49, %v198_v45 }
 0x479   :  { %396 = vrot.lane.b32.xlu1 %v395_v51, %s462_s0 }
 0x47a   :  { %v203_v52 = vpop.permute.xlu1 %202 }
 0x47b   :  { %208 = vrot.lane.b32.xlu0 %v203_v52, %s462_s0 }
 0x47d   :  { %192 = vrot.lane.b32.xlu1 %v187_v47, %s461_s1 }
 0x47e   :  { %v190_v53 = vpop.permute.xlu1 %189 }
 0x4eb   :  { %v397_v54 = vpop.permute.xlu1 %396 }
 0x4ec   :  { %v399_v55 = vunpack.i.h.bf16 %v397_v54  ;;  %v398_v56 = vunpack.i.l.bf16 %v397_v54 }
 0x4ed   :  { %v209_v59 = vpop.permute.xlu0 %208 }
 0x4ee   :  { %v213_v57 = vsel %vm72_vm2, %v187_v47, %v398_v56  ;;  %v214_v58 = vsel %vm72_vm2, %v190_v53, %v399_v55 }
 0x4ef   :  { %v193_v60 = vpop.permute.xlu1 %192  ;;  %v366_v61 = vpack.c.bf16 %v214_v58, %v213_v57 }
 0x4f0   :  { %v215_v62 = vsel %vm72_vm2, %v193_v60, %v209_v59 }
 0x4f1   :  { %367 = vmatpush3.bf16.msra.mxu1 %v366_v61  ;;  %v369_v0 = vpack.c.bf16 %v468_v63, %v215_v62 }
 0x4f2   :  { %368 = vmatprep.subr.bf16.mxu1 %v465_v48 }
 0x4f5   :  { %370 = vmatpush3.bf16.msra.mxu1 %v369_v0 }
 0x4f8   :  { %359 = vmatmul.mubr.msk.f32.vlgmr.msra.gmra.mrb[0].mxu1 %vm158_vm3, %v36_v1 }
 0x5cb   :  { %v285_v2 = vpop.f32.mrb[0].mxu1 }
 0x5cc   :  { %v289_v3 = vmax.f32 %v285_v2, 0.0  ;;  %v360_v4 = vpop.f32.mrb[1].mxu1 }
 0x5ce   :  { %v290_v5 = vsel %vm158_vm3, %v289_v3, 0.0 }
 0x5cf   :  { %291 = vadd.xlane.f32.xlu1 %v290_v5 }
 0x5e0   :  { %309 = vperm.xlu1 %401, %v534_v28  }
 0x65c   :  { %v292_v8 = vpop.xlane.xlu1 %291 }
 0x65d   :  { %v293_v9 = vmul.f32 0.03125, %v292_v8 }
 0x65f   :  { %v294_v10 = vsub.f32 %v289_v3, %v293_v9 }
 0x660   :  { %v310_v19 = vpop.permute.xlu1 %309 }
 0x661   :  { %v295_v11 = vmul.f32 %v294_v10, %v294_v10 }
 0x663   :  { %v296_v12 = vsel %vm158_vm3, %v295_v11, 0.0 }
 0x664   :  { %297 = vadd.xlane.f32.xlu0 %v296_v12 }
 0x67a   :  { %304 = vperm.xlu0 %400, %v534_v28  }
 0x67e   :  { %402 = vset.pattern.permute.xlu0 %v470_v7 }
 0x6f1   :  { %v298_v13 = vpop.xlane.xlu0 %297 }
 0x6f2   :  { %v299_v14 = vmul.f32 0.03125, %v298_v13 }
 0x6f4   :  { %v300_v15 = vadd.f32 1e-05, %v299_v14 }
 0x6f6   :  { %405 = vrsqrt.f32 %v300_v15 }
 0x6f9   :  { %v305_v17 = vpop.permute.xlu0 %304 }
 0x700   :  { %v406_v16 = vpop.eup %405 }
 0x701   :  { %v302_v18 = vmul.f32 %v406_v16, %v294_v10 }
 0x703   :  { %v307_v20 = vmul.f32 %v305_v17, %v302_v18 }
 0x705   :  { %v312_v21 = vadd.f32 %v310_v19, %v307_v20 }
 0x707   :  { %v313_v22 = vadd.f32 %v528_v23, %v312_v21 }
 0x709   :  { %v314_v24 = vmax.f32 %v313_v22, 0.0 }
 0x70b   :  { %315 = vst.msk [vmem:[#allocation5] sm:$0xff] %vm158_vm3, %v314_v24 }
 0x70c   :  { %440 = shalt.err (!%p437_p12)
}
 0x70d   :  { %s441_s15 = scalar_lea.hbm %s578_s4, 128 }
 0x70e   :  { %p442_p13 = scmp.ne.s32.totalorder %s578_s4, %s441_s15  ;;  %p445_p0 = scmp.lt.u32.totalorder %s441_s15, %s578_s4 }
 0x710   :  { %p447_p1 = pnand %p445_p0, %p442_p13 }
 0x712   :  { %450 = shalt.err (!%p447_p1)
}
 0x713   :  { %325 = dma.vmem_to_hbm [thread:$0]  %s323_s11, 128, %s578_s4, [#allocation4]  }
 0x714   :  { %453 = dma.done.wait [#allocation4], 128  }
 0x715   :  { %454 = vsyncadd [#allocation4], 4294967168 }
 0x716   :  { %329 = vsyncpa [#allocation3], 1 }
 0x717   :  { %330 = vsyncpa [#allocation4], 1 }

</bundles_post_ra>
